<compile_context>
chip_gen: v5e
topology: v5e:2x2
jax: 0.10.0
libtpu: 0.0.40
codegen_flags: <defaults>
</compile_context>

<pallas_src>
import functools

import jax
import jax.numpy as jnp
from jax.experimental import pallas as pl
from jax.experimental.pallas import tpu as pltpu

_LANE = 128
_SUBLANE = 8
_NEG_BIAS = -1e30   # padded-class bias: exp(logit - max) == 0 exactly
_MIN_TILE = 512     # mem-bound tiles need ~512+ rows to approach HBM roofline
_TARGET_TILES = 8   # aim for ~8 grid steps: pipeline depth + 2 TCs on v7x


def _round_up(n, m):
    return ((n + m - 1) // m) * m


def _make_mlp_kernel(num_hidden):
    """Fused forward for one (TB, in_features) batch tile.

    Ref order: x, (W_i, b_i) * num_hidden, W_out, b_out, out.
    relu(x@W+b) chain -> output Linear -> log_softmax over (padded) classes.
    bf16 operands into the MXU, f32 accumulation, f32 elementwise, bf16 store.
    """

    def kernel(*refs):
        x_ref, out_ref = refs[0], refs[-1]
        wb = refs[1:-1]

        h = x_ref[...].astype(jnp.bfloat16)              # MXU wants bf16 operands
        for li in range(num_hidden):
            w, b = wb[2 * li], wb[2 * li + 1]
            h = jnp.dot(h, w[...], preferred_element_type=jnp.float32) + b[...]
            h = jnp.maximum(h, 0.0).astype(jnp.bfloat16)  # ReLU; dropout == identity (eval)

        wo, bo = wb[2 * num_hidden], wb[2 * num_hidden + 1]
        logits = jnp.dot(h, wo[...], preferred_element_type=jnp.float32) + bo[...]

        # Numerically stable log_softmax over the padded class axis.
        # Padded classes carry a -1e30 bias -> exp(shifted) is exactly 0, so
        # the denominator matches the unpadded computation.
        m = jnp.max(logits, axis=1, keepdims=True)
        shifted = logits - m
        s = jnp.sum(jnp.exp(shifted), axis=1, keepdims=True)
        out_ref[...] = (shifted - jnp.log(s)).astype(out_ref.dtype)

    return kernel


def prepare_params(weights, biases):
    """One-time (model-load) prep, hoisted out of the per-call jitted forward.

    * hidden widths padded to multiples of 128 (zero rows/cols, zero bias) so
      intermediate activations are lane-dense,
    * class dim padded to a multiple of 128 (zero cols, -1e30 bias),
    * weights cast to bf16, biases kept f32 as (1, width).

    weights[i] is (fan_in, fan_out) = transpose of torch Linear.weight.
    Returns (params_tuple, out_size).
    """
    num_layers = len(weights)
    out_size = int(weights[-1].shape[1])
    params = []
    prev_pad = int(weights[0].shape[0])  # input features stay unpadded (x is not padded)
    for li, (w, b) in enumerate(zip(weights, biases)):
        fan_in, fan_out = int(w.shape[0]), int(w.shape[1])
        is_out = li == num_layers - 1
        out_pad = _round_up(fan_out, _LANE)
        w_p = jnp.zeros((prev_pad, out_pad), jnp.float32).at[:fan_in, :fan_out].set(w)
        fill = _NEG_BIAS if is_out else 0.0
        b_p = jnp.full((1, out_pad), fill, jnp.float32)
        b_p = b_p.at[:, :fan_out].set(jnp.reshape(b, (1, fan_out)).astype(jnp.float32))
        params.append(w_p.astype(jnp.bfloat16))
        params.append(b_p)
        prev_pad = out_pad
    return tuple(params), out_size


@functools.partial(jax.jit, static_argnames=("out_size", "block_batch", "unpad"))
def nn_classifier_forward(x, params, out_size, *, block_batch=4096, unpad=True):
    batch, in_features = x.shape
    num_hidden = len(params) // 2 - 1
    out_pad = params[-1].shape[1]

    # --- batch tiling --------------------------------------------------------
    # Pad batch only to a sublane multiple; the grid handles the ragged last
    # tile (masked stores), so no up-to-TB-1 junk rows of wasted matmul work.
    padded8 = _round_up(batch, _SUBLANE)
    if padded8 != batch:
        x = jnp.pad(x, ((0, padded8 - batch), (0, 0)))

    tb = _round_up(max(1, pl.cdiv(padded8, _TARGET_TILES)), _SUBLANE)
    tb = max(tb, _MIN_TILE)       # amortize per-step overhead / DMA setup
    tb = min(tb, block_batch)     # cap per-step working set
    tb = min(tb, padded8)
    grid = (pl.cdiv(padded8, tb),)

    # --- specs ---------------------------------------------------------------
    in_specs = [pl.BlockSpec((tb, in_features), lambda i: (i, 0))]      # x tile
    for p in params:                                                    # resident weights/biases
        in_specs.append(pl.BlockSpec(p.shape, lambda i: (0, 0)))
    out_spec = pl.BlockSpec((tb, out_pad), lambda i: (i, 0))            # lane-dense bf16 tile

    # --- VMEM budget (generation-aware) --------------------------------------
    weight_bytes = sum(int(p.size) * p.dtype.itemsize for p in params)
    io_bytes = 2 * (tb * in_features * x.dtype.itemsize + tb * out_pad * 2)  # dbl-buffered x + bf16 out
    widest = max(int(p.shape[1]) for p in params)
    tmp_bytes = 8 * tb * widest * 4                     # headroom for f32 intermediates
    vmem_limit = int(min(max(io_bytes + 2 * weight_bytes + tmp_bytes, 32 << 20), 48 << 20))

    per_row_flops = 0
    for li in range(num_hidden + 1):
        w = params[2 * li]
        per_row_flops += 2 * int(w.shape[0]) * int(w.shape[1])
    rows = grid[0] * tb
    cost = pl.CostEstimate(
        flops=rows * per_row_flops,
        transcendentals=rows * (out_pad + 1),           # exp per padded class + log per row
        bytes_accessed=(padded8 * in_features * x.dtype.itemsize
                        + weight_bytes
                        + padded8 * out_pad * 2),       # bf16 output
    )

    out = pl.pallas_call(
        _make_mlp_kernel(num_hidden),
        out_shape=jax.ShapeDtypeStruct((padded8, out_pad), jnp.bfloat16),
        grid=grid,
        in_specs=in_specs,
        out_specs=out_spec,
        compiler_params=pltpu.CompilerParams(
            dimension_semantics=("parallel",),          # shard batch tiles across TCs on v7x
            vmem_limit_bytes=vmem_limit,
        ),
        cost_estimate=cost,
    )(x, *params)

    if not unpad:
        # Padded bf16 (padded8, out_pad): hand directly to a fused consumer
        # (NLL loss / argmax) to avoid the post-kernel slice copy entirely.
        return out
    return out[:batch, :out_size].astype(jnp.float32)


if __name__ == "__main__":
    # Module config: NN_Classifier(input_size=32, output_size=10,
    #                              hidden_layers=[64, 32], drop_p=0.5)
    input_size = 32
    output_size = 10
    hidden_layers = [64, 32]
    batch = 8

    key = jax.random.PRNGKey(0)
    k_x, k1, k2, k3 = jax.random.split(key, 4)

    x = jax.random.normal(k_x, (batch, input_size), jnp.float32)

    def init_linear(k, fan_in, fan_out):
        """Matches nn.Linear's U(-1/sqrt(fan_in), 1/sqrt(fan_in)) init."""
        kw, kb = jax.random.split(k)
        bound = 1.0 / jnp.sqrt(fan_in)
        w = jax.random.uniform(kw, (fan_in, fan_out), jnp.float32, -bound, bound)
        b = jax.random.uniform(kb, (fan_out,), jnp.float32, -bound, bound)
        return w, b

    sizes = [input_size] + hidden_layers + [output_size]
    ws, bs = [], []
    for k, (fi, fo) in zip([k1, k2, k3], zip(sizes[:-1], sizes[1:])):
        w, b = init_linear(k, fi, fo)
        ws.append(w)
        bs.append(b)

    params, out_size = prepare_params(ws, bs)   # load-time: pad + bf16 cast, once
    out = nn_classifier_forward(x, params, out_size)
    out = jax.block_until_ready(out)
    assert out.shape == (batch, output_size)
    assert bool(jnp.all(jnp.isfinite(out)))

    # Pure-JAX f32 reference (eval-mode dropout == identity).
    h = x
    for w, b in zip(ws[:-1], bs[:-1]):
        h = jnp.maximum(h @ w + b, 0.0)
    ref = jax.nn.log_softmax(h @ ws[-1] + bs[-1], axis=1)

    # Kernel uses bf16 MXU operands + bf16 output store -> loose tolerance.
    assert jnp.allclose(out, ref, atol=5e-2, rtol=5e-2), "mismatch vs f32 reference"
    # log_softmax rows should exponentiate-and-sum to ~1 (bf16 store tolerance).
    assert jnp.allclose(jnp.sum(jnp.exp(out), axis=1), 1.0, atol=2e-2)

    print("KERNEL_OK")
</pallas_src>

<mosaic_0001>
module attributes {stable_mosaic.version = 11 : i64} {
  func.func @kernel(%arg0: i32, %arg1: memref<8x32xf32, #tpu.memory_space<vmem>>, %arg2: memref<32x128xbf16, #tpu.memory_space<vmem>>, %arg3: memref<1x128xf32, #tpu.memory_space<vmem>>, %arg4: memref<128x128xbf16, #tpu.memory_space<vmem>>, %arg5: memref<1x128xf32, #tpu.memory_space<vmem>>, %arg6: memref<128x128xbf16, #tpu.memory_space<vmem>>, %arg7: memref<1x128xf32, #tpu.memory_space<vmem>>, %arg8: memref<8x128xbf16, #tpu.memory_space<vmem>>) attributes {dimension_semantics = [#tpu.dimension_semantics<parallel>], iteration_bounds = array<i64: 1>, scalar_prefetch = 0 : i64, scratch_operands = 0 : i64, tpu.core_type = #tpu.core_type<tc>, window_params = [{transform_indices = @transform_0, window_bounds = array<i64: 8, 32>}, {pipeline_mode = #tpu.pipeline_mode<synchronous>, transform_indices = @transform_1, window_bounds = array<i64: 32, 128>}, {pipeline_mode = #tpu.pipeline_mode<synchronous>, transform_indices = @transform_2, window_bounds = array<i64: 1, 128>}, {pipeline_mode = #tpu.pipeline_mode<synchronous>, transform_indices = @transform_3, window_bounds = array<i64: 128, 128>}, {pipeline_mode = #tpu.pipeline_mode<synchronous>, transform_indices = @transform_4, window_bounds = array<i64: 1, 128>}, {pipeline_mode = #tpu.pipeline_mode<synchronous>, transform_indices = @transform_5, window_bounds = array<i64: 128, 128>}, {pipeline_mode = #tpu.pipeline_mode<synchronous>, transform_indices = @transform_6, window_bounds = array<i64: 1, 128>}, {transform_indices = @transform_7, window_bounds = array<i64: 8, 128>}]} {
    %c0 = arith.constant 0 : index
    %c0_0 = arith.constant 0 : index
    %0 = vector.load %arg1[%c0, %c0_0] : memref<8x32xf32, #tpu.memory_space<vmem>>, vector<8x32xf32>
    %1 = arith.truncf %0 : vector<8x32xf32> to vector<8x32xbf16>
    %c0_1 = arith.constant 0 : index
    %c0_2 = arith.constant 0 : index
    %2 = vector.load %arg2[%c0_1, %c0_2] : memref<32x128xbf16, #tpu.memory_space<vmem>>, vector<32x128xbf16>
    %cst = arith.constant dense<0.000000e+00> : vector<8x128xf32>
    %3 = tpu.matmul %1, %2, %cst {dimension_numbers = #tpu.dot_dimension_numbers<[1], [0], [0], [1], [0, 0, 1, 1], [], []>} : vector<8x32xbf16>, vector<32x128xbf16>, vector<8x128xf32> -> vector<8x128xf32>
    %c0_3 = arith.constant 0 : index
    %c0_4 = arith.constant 0 : index
    %4 = vector.load %arg3[%c0_3, %c0_4] : memref<1x128xf32, #tpu.memory_space<vmem>>, vector<1x128xf32>
    %5 = vector.broadcast %4 : vector<1x128xf32> to vector<8x128xf32>
    %6 = arith.addf %3, %5 : vector<8x128xf32>
    %cst_5 = arith.constant 0.000000e+00 : f32
    %7 = vector.broadcast %cst_5 : f32 to vector<8x128xf32>
    %8 = arith.maximumf %6, %7 : vector<8x128xf32>
    %9 = arith.truncf %8 : vector<8x128xf32> to vector<8x128xbf16>
    %c0_6 = arith.constant 0 : index
    %c0_7 = arith.constant 0 : index
    %10 = vector.load %arg4[%c0_6, %c0_7] : memref<128x128xbf16, #tpu.memory_space<vmem>>, vector<128x128xbf16>
    %cst_8 = arith.constant dense<0.000000e+00> : vector<8x128xf32>
    %11 = tpu.matmul %9, %10, %cst_8 {dimension_numbers = #tpu.dot_dimension_numbers<[1], [0], [0], [1], [0, 0, 1, 1], [], []>} : vector<8x128xbf16>, vector<128x128xbf16>, vector<8x128xf32> -> vector<8x128xf32>
    %c0_9 = arith.constant 0 : index
    %c0_10 = arith.constant 0 : index
    %12 = vector.load %arg5[%c0_9, %c0_10] : memref<1x128xf32, #tpu.memory_space<vmem>>, vector<1x128xf32>
    %13 = vector.broadcast %12 : vector<1x128xf32> to vector<8x128xf32>
    %14 = arith.addf %11, %13 : vector<8x128xf32>
    %cst_11 = arith.constant 0.000000e+00 : f32
    %15 = vector.broadcast %cst_11 : f32 to vector<8x128xf32>
    %16 = arith.maximumf %14, %15 : vector<8x128xf32>
    %17 = arith.truncf %16 : vector<8x128xf32> to vector<8x128xbf16>
    %c0_12 = arith.constant 0 : index
    %c0_13 = arith.constant 0 : index
    %18 = vector.load %arg6[%c0_12, %c0_13] : memref<128x128xbf16, #tpu.memory_space<vmem>>, vector<128x128xbf16>
    %cst_14 = arith.constant dense<0.000000e+00> : vector<8x128xf32>
    %19 = tpu.matmul %17, %18, %cst_14 {dimension_numbers = #tpu.dot_dimension_numbers<[1], [0], [0], [1], [0, 0, 1, 1], [], []>} : vector<8x128xbf16>, vector<128x128xbf16>, vector<8x128xf32> -> vector<8x128xf32>
    %c0_15 = arith.constant 0 : index
    %c0_16 = arith.constant 0 : index
    %20 = vector.load %arg7[%c0_15, %c0_16] : memref<1x128xf32, #tpu.memory_space<vmem>>, vector<1x128xf32>
    %21 = vector.broadcast %20 : vector<1x128xf32> to vector<8x128xf32>
    %22 = arith.addf %19, %21 : vector<8x128xf32>
    %cst_17 = arith.constant dense<0xFF800000> : vector<8xf32>
    %23 = vector.multi_reduction <maximumf>, %22, %cst_17 [1] : vector<8x128xf32> to vector<8xf32>
    %24 = vector.shape_cast %23 : vector<8xf32> to vector<8x1xf32>
    %25 = vector.broadcast %24 : vector<8x1xf32> to vector<8x128xf32>
    %26 = arith.subf %22, %25 : vector<8x128xf32>
    %27 = math.exp %26 : vector<8x128xf32>
    %cst_18 = arith.constant dense<0.000000e+00> : vector<8xf32>
    %28 = vector.multi_reduction <add>, %27, %cst_18 [1] : vector<8x128xf32> to vector<8xf32>
    %29 = vector.shape_cast %28 : vector<8xf32> to vector<8x1xf32>
    %30 = math.log %29 : vector<8x1xf32>
    %31 = vector.broadcast %30 : vector<8x1xf32> to vector<8x128xf32>
    %32 = arith.subf %26, %31 : vector<8x128xf32>
    %33 = arith.truncf %32 : vector<8x128xf32> to vector<8x128xbf16>
    %c0_19 = arith.constant 0 : index
    %c0_20 = arith.constant 0 : index
    %34 = vector.load %arg8[%c0_19, %c0_20] : memref<8x128xbf16, #tpu.memory_space<vmem>>, vector<8x128xbf16>
    tpu.vector_store %arg8[%c0_19, %c0_20], %33 {strides = array<i32>} : memref<8x128xbf16, #tpu.memory_space<vmem>>, vector<8x128xbf16>,
    return
  }
  func.func @transform_0(%arg0: i32) -> (i32, i32) {
    %c0_i32 = arith.constant 0 : i32
    %c0_i32_0 = arith.constant 0 : i32
    return %arg0, %c0_i32 : i32, i32
  }
  func.func @transform_1(%arg0: i32) -> (i32, i32) {
    %c0_i32 = arith.constant 0 : i32
    %c0_i32_0 = arith.constant 0 : i32
    %c0_i32_1 = arith.constant 0 : i32
    return %c0_i32, %c0_i32_0 : i32, i32
  }
  func.func @transform_2(%arg0: i32) -> (i32, i32) {
    %c0_i32 = arith.constant 0 : i32
    %c0_i32_0 = arith.constant 0 : i32
    %c0_i32_1 = arith.constant 0 : i32
    return %c0_i32, %c0_i32_0 : i32, i32
  }
  func.func @transform_3(%arg0: i32) -> (i32, i32) {
    %c0_i32 = arith.constant 0 : i32
    %c0_i32_0 = arith.constant 0 : i32
    %c0_i32_1 = arith.constant 0 : i32
    return %c0_i32, %c0_i32_0 : i32, i32
  }
  func.func @transform_4(%arg0: i32) -> (i32, i32) {
    %c0_i32 = arith.constant 0 : i32
    %c0_i32_0 = arith.constant 0 : i32
    %c0_i32_1 = arith.constant 0 : i32
    return %c0_i32, %c0_i32_0 : i32, i32
  }
  func.func @transform_5(%arg0: i32) -> (i32, i32) {
    %c0_i32 = arith.constant 0 : i32
    %c0_i32_0 = arith.constant 0 : i32
    %c0_i32_1 = arith.constant 0 : i32
    return %c0_i32, %c0_i32_0 : i32, i32
  }
  func.func @transform_6(%arg0: i32) -> (i32, i32) {
    %c0_i32 = arith.constant 0 : i32
    %c0_i32_0 = arith.constant 0 : i32
    %c0_i32_1 = arith.constant 0 : i32
    return %c0_i32, %c0_i32_0 : i32, i32
  }
  func.func @transform_7(%arg0: i32) -> (i32, i32) {
    %c0_i32 = arith.constant 0 : i32
    %c0_i32_0 = arith.constant 0 : i32
    return %arg0, %c0_i32 : i32, i32
  }
}

</mosaic_0001>

<bundles_post_ra>
// kernel: nn_classifier_forward.1
= control target key start
LH: loop header
LB: loop body
LE: loop exit
PB: predicated region body
PF: predicated region fallthrough
CT: control target
= control target key end

     0   :  { %12 = vsyncpa [#allocation3], 0  ;;  %s588_s0 = inlined_call_operand.hbm [shape: f32[8,32], index: 0, kind: input, shape index: {}]   ;;  %s589_s1 = inlined_call_operand.hbm [shape: bf16[32,128], index: 1, kind: input, shape index: {}]   ;;  %s590_s2 = inlined_call_operand.vmem [shape: f32[1,128], index: 2, kind: input, shape index: {}]   ;;  %s591_s3 = inlined_call_operand.hbm [shape: bf16[128,128], index: 3, kind: input, shape index: {}]   ;;  %s592_s4 = inlined_call_operand.vmem [shape: f32[1,128], index: 4, kind: input, shape index: {}]   ;;  %s593_s5 = inlined_call_operand.hbm [shape: bf16[128,128], index: 5, kind: input, shape index: {}]   ;;  %s594_s6 = inlined_call_operand.vmem [shape: f32[1,128], index: 6, kind: input, shape index: {}]   ;;  %s595_s7 = inlined_call_operand.vmem [shape: bf16[8,128], index: 7, kind: output, shape index: {}]  }
   0x1   :  { %13 = vsyncpa [#allocation5], 0  ;;  %s30_s26 = sshll.u32 %s589_s1, 4  ;;  %s31_s26 = int_to_ptr.hbm [resolvable:$true] %s30_s26 }
   0x2   :  { %14 = vsyncpa [#allocation8], 0  ;;  %s518_s27 = smov [#allocation4]   ;;  %s20_s8 = sshll.u32 %s588_s0, 4  ;;  %s21_s8 = int_to_ptr.hbm [resolvable:$true] %s20_s8 }
   0x3   :  { %s32_s28 = sshll.u32 %s518_s27, 4  ;;  %s519_s9 = smov 64   ;;  %s33_s28 = int_to_ptr.vmem [resolvable:$true] %s32_s28 }
   0x4   :  { %s520_s10 = smov 4   ;;  %s521_s11 = smov [#allocation2]  }
   0x5   :  { %38 = dma.hbm_to_vmem [thread:$0]  %s31_s26, 256, %s33_s28, [#allocation5], %s519_s9, %s519_s9, %s520_s10  }
   0x6   :  { %s22_s12 = sshll.u32 %s521_s11, 4  ;;  %s45_s15 = sshll.u32 %s591_s3, 4  ;;  %s23_s12 = int_to_ptr.vmem [resolvable:$true] %s22_s12  ;;  %s46_s15 = int_to_ptr.hbm [resolvable:$true] %s45_s15 }
   0x7   :  { %25 = dma.hbm_to_vmem [thread:$0]  %s21_s8, 128, %s23_s12, [#allocation3]  }
   0x8   :  { %s60_s17 = sshll.u32 %s593_s5, 4  ;;  %s522_s18 = smov [#allocation6]   ;;  %s61_s17 = int_to_ptr.hbm [resolvable:$true] %s60_s17 }
   0x9   :  { %s47_s19 = sshll.u32 %s522_s18, 4  ;;  %s523_s0 = smov [#allocation7]   ;;  %s48_s19 = int_to_ptr.vmem [resolvable:$true] %s47_s19 }
   0xa   :  { %53 = dma.hbm_to_vmem [thread:$0]  %s46_s15, 1024, %s48_s19, [#allocation5], %s519_s9, %s519_s9, %s520_s10  }
   0xb   :  { %s62_s20 = sshll.u32 %s523_s0, 4  ;;  %s63_s20 = int_to_ptr.vmem [resolvable:$true] %s62_s20 }
   0xc   :  { %68 = dma.hbm_to_vmem [thread:$0]  %s61_s17, 1024, %s63_s20, [#allocation8], %s519_s9, %s519_s9, %s520_s10  }
   0xd   :  { %512 = dma.done.wait [#allocation3], 128  }
   0xe   :  { %513 = vsyncadd [#allocation3], 4294967168 }
   0xf   :  { %514 = dma.done.wait [#allocation5], 1280  }
  0x10   :  { %515 = vsyncadd [#allocation5], 4294966016 }
  0x11   :  { %516 = dma.done.wait [#allocation8], 1024  }
  0x12   :  { %517 = vsyncadd [#allocation8], 4294966272  ;;  %v386_v0 = vld [vmem:[#allocation4 + $0x8] sm:$0xff]  ;;  %v385_v2 = vld [vmem:[#allocation4] sm:$0xff]  ;;  %vm110_vm0 = vcmask 261120  }
  0x13   :  { %v394_v1 = vld [vmem:[#allocation6 + $0x38] sm:$0xff]  ;;  %120 = vmatpush.bf16.msra.mxu0 %v386_v0  ;;  %v88_v3 = vld [vmem:[#allocation2] sm:$0xff]  ;;  %v393_v4 = vld [vmem:[#allocation6 + $0x30] sm:$0xff] }
  0x14   :  { %197 = vmatpush.bf16.msra.mxu1 %v394_v1  ;;  %v89_v5 = vpack.c.bf16 %v88_v3, %v88_v3  ;;  %v392_v6 = vld [vmem:[#allocation6 + $0x28] sm:$0xff]  ;;  %v391_v7 = vld [vmem:[#allocation6 + $0x20] sm:$0xff]  ;;  %v390_v8 = vld [vmem:[#allocation6 + $0x18] sm:$0xff] }
  0x15   :  { %v389_v9 = vld [vmem:[#allocation6 + $0x10] sm:$0xff]  ;;  %v388_v10 = vld [vmem:[#allocation6 + $0x8] sm:$0xff]  ;;  %v387_v11 = vld [vmem:[#allocation6] sm:$0xff] }
  0x16   :  { %v402_v12 = vld [vmem:[#allocation7 + $0x38] sm:$0xff]  ;;  %v401_v13 = vld [vmem:[#allocation7 + $0x30] sm:$0xff]  ;;  %v400_v14 = vld [vmem:[#allocation7 + $0x28] sm:$0xff] }
  0x17   :  { %121 = vmatpush.bf16.msra.mxu0 %v385_v2  ;;  %280 = vmatpush.bf16.msra.mxu2 %v402_v12  ;;  %v399_v15 = vld [vmem:[#allocation7 + $0x20] sm:$0xff]  ;;  %v398_v16 = vld [vmem:[#allocation7 + $0x18] sm:$0xff]  ;;  %v397_v17 = vld [vmem:[#allocation7 + $0x10] sm:$0xff] }
  0x18   :  { %198 = vmatpush.bf16.msra.mxu1 %v393_v4  ;;  %v409_v18 = vld [vmem:[%s590_s2] ss:$0 sm:$0xff]  ;;  %v395_v25 = vld [vmem:[#allocation7] sm:$0xff] }
  0x19   :  { %v396_v24 = vld [vmem:[#allocation7 + $0x8] sm:$0xff] }
  0x1a   :  { %320 = vmatmul.msk.bf16.vlgmr.msra.gmra.mxu0 %vm110_vm0, %v89_v5  ;;  %v410_v26 = vld [vmem:[%s592_s4] ss:$0 sm:$0xff] }
  0x1b   :  { %281 = vmatpush.bf16.msra.mxu2 %v401_v13  ;;  %v411_v32 = vld [vmem:[%s594_s6] ss:$0 sm:$0xff] }
  0x1c   :  { %199 = vmatpush.bf16.msra.mxu1 %v392_v6 }
  0x1f   :  { %282 = vmatpush.bf16.msra.mxu2 %v400_v14 }
  0x20   :  { %200 = vmatpush.bf16.msra.mxu1 %v391_v7 }
  0x23   :  { %283 = vmatpush.bf16.msra.mxu2 %v399_v15 }
  0x24   :  { %201 = vmatpush.bf16.msra.mxu1 %v390_v8 }
  0x27   :  { %284 = vmatpush.bf16.msra.mxu2 %v398_v16 }
  0x28   :  { %202 = vmatpush.bf16.msra.mxu1 %v389_v9 }
  0x2b   :  { %285 = vmatpush.bf16.msra.mxu2 %v397_v17 }
  0x2c   :  { %203 = vmatpush.bf16.msra.mxu1 %v388_v10 }
  0x2f   :  { %286 = vmatpush.bf16.msra.mxu2 %v396_v24 }
  0x30   :  { %204 = vmatpush.bf16.msra.mxu1 %v387_v11 }
  0x33   :  { %287 = vmatpush.bf16.msra.mxu2 %v395_v25 }
  0x97   :  { %v123_v19 = vpop.f32.mrf.mxu0 }
  0x98   :  { %v124_v20 = vadd.f32 %v409_v18, %v123_v19 }
  0x9a   :  { %v127_v21 = vmax.f32 %v124_v20, 0.0 }
  0x9c   :  { %v128_v22 = vpack.c.bf16 %v127_v21, %v127_v21 }
  0x9e   :  { %205 = vmatmul.bf16.vlgmr.msra.gmra.mxu1 %v128_v22 }
  0x9f   :  { %v125_v23 = vpop.f32.mrf.mxu0 }
 0x11b   :  { %v206_v27 = vpop.f32.mrf.mxu1 }
 0x11c   :  { %v207_v28 = vadd.f32 %v410_v26, %v206_v27 }
 0x11e   :  { %v210_v29 = vmax.f32 %v207_v28, 0.0 }
 0x120   :  { %v211_v30 = vpack.c.bf16 %v210_v29, %v210_v29 }
 0x122   :  { %288 = vmatmul.bf16.vlgmr.msra.gmra.mxu2 %v211_v30 }
 0x123   :  { %v208_v31 = vpop.f32.mrf.mxu1 }
 0x1a5   :  { %v289_v33 = vpop.f32.mrf.mxu2 }
 0x1a6   :  { %v290_v34 = vadd.f32 %v411_v32, %v289_v33 }
 0x1a8   :  { %293 = vmax.xlane.f32.xlu0 %v290_v34 }
 0x1ad   :  { %v291_v35 = vpop.f32.mrf.mxu2 }
 0x21b   :  { %v294_v36 = vpop.xlane.xlu0 %293 }
 0x21c   :  { %v295_v37 = vsub.f32 %v290_v34, %v294_v36 }
 0x21e   :  { %v296_v38 = vmul.f32 1.442695, %v295_v37 }
 0x220   :  { %412 = vpow2.f32 %v296_v38 }
 0x226   :  { %v413_v39 = vpop.eup %412 }
 0x227   :  { %298 = vadd.xlane.f32.xlu0 %v413_v39 }
 0x29a   :  { %v299_v40 = vpop.xlane.xlu0 %298 }
 0x29b   :  { %414 = vlog2.f32 %v299_v40 }
 0x2a1   :  { %v415_v41 = vpop.eup %414 }
 0x2a2   :  { %v301_v42 = vmul.f32 0.6931472, %v415_v41 }
 0x2a4   :  { %v302_v43 = vsub.f32 %v295_v37, %v301_v42 }
 0x2a6   :  { %v303_v44 = vpack.c.bf16 %v302_v43, %v302_v43 }
 0x2a8   :  { %304 = vst [vmem:[%s595_s7] sm:$0xf] %v303_v44 }
 0x2a9   :  { %309 = vsyncpa [#allocation3], 1 }
 0x2aa   :  { %310 = vsyncpa [#allocation5], 1 }
 0x2ab   :  { %311 = vsyncpa [#allocation8], 1 }

</bundles_post_ra>
